<compile_context>
chip_gen: v7x
topology: tpu7x:2x2x1
jax: 0.10.0
libtpu: 0.0.40
codegen_flags: <defaults>
</compile_context>

<pallas_src>
import functools

import jax
import jax.numpy as jnp
from jax.experimental import pallas as pl
from jax.experimental.pallas import tpu as pltpu


VMEM_LIMIT_BYTES = 48 * 1024 * 1024   # <= 48 MiB: safe on v5e/v6e (128 MiB) and v7x (64 MiB)


# ----------------------------- tiling helpers ------------------------------ #

def _pick_row_tile(n_rows, n_cols, *, target=1024, bytes_per_el=4,
                   tile_budget_bytes=6 * 1024 * 1024):
    """Largest row tile <= target (multiple of 16) keeping one (tile, n_cols)
    stream buffer under a per-buffer VMEM budget; full row count if it fits."""
    cap = max(16, (tile_budget_bytes // max(1, n_cols * bytes_per_el)) // 16 * 16)
    tile = min(target, cap)
    return n_rows if n_rows <= tile else tile


def _pick_fused_row_tile(n_rows, d_in, d_out, hidden=0, *, target=256,
                         budget_bytes=40 * 1024 * 1024, resident_bytes=0):
    """Row tile for the fused matmul kernels: double-buffered x/out streams +
    in-kernel temporaries + resident bf16 weights must fit the VMEM budget."""
    per_row = 2 * 4 * (d_in + d_out)          # double-buffered x-in / out, f32
    per_row += 4 * (d_in + hidden + d_out)    # normed / hidden / acc temporaries
    avail = max(1 << 20, budget_bytes - resident_bytes)
    cap = max(16, (avail // per_row) // 16 * 16)
    tile = min(target, cap)
    return n_rows if n_rows <= tile else tile


def _gelu_tanh(x):
    # tanh-approximate GELU (lowered to EUP tanh).
    # TODO(synk): PyTorch nn.GELU default is the exact erf formulation.
    return 0.5 * x * (1.0 + jnp.tanh(0.7978845608028654 * (x + 0.044715 * x * x * x)))


# ------------------------------- kernels ----------------------------------- #

def _layernorm_kernel(x_ref, w_ref, b_ref, o_ref, *, embed_dim, eps, approx):
    x = x_ref[...].astype(jnp.float32)                         # (tile, D)
    mean = jnp.mean(x, axis=-1, keepdims=True)
    c = x - mean
    # torch.Tensor.std uses Bessel's correction (unbiased, /(D-1))
    var = jnp.sum(c * c, axis=-1, keepdims=True) / (embed_dim - 1)
    inv = pl.reciprocal(jnp.sqrt(var) + eps, approx=approx)    # EUP slot
    o_ref[...] = (w_ref[...].astype(jnp.float32) * (c * inv)
                  + b_ref[...].astype(jnp.float32)).astype(o_ref.dtype)


def _residual_add_kernel(x_ref, y_ref, o_ref):
    o_ref[...] = x_ref[...] + y_ref[...]


def _fused_ln_linear_residual_kernel(x_ref, w_ref, b_ref, lnw_ref, lnb_ref,
                                     o_ref, *, embed_dim, eps, approx):
    """out = x + (LN(x) @ W + b). Single grid axis over row blocks; W (bf16) is
    resident in VMEM; the residual reuses the already-loaded x row block."""
    x = x_ref[...].astype(jnp.float32)                         # (tm, D)
    mean = jnp.mean(x, axis=-1, keepdims=True)
    c = x - mean
    var = jnp.sum(c * c, axis=-1, keepdims=True) / (embed_dim - 1)
    inv = pl.reciprocal(jnp.sqrt(var) + eps, approx=approx)
    normed = (lnw_ref[...].astype(jnp.float32) * (c * inv)
              + lnb_ref[...].astype(jnp.float32))
    acc = jnp.dot(normed.astype(jnp.bfloat16), w_ref[...],      # bf16 MXU operands
                  preferred_element_type=jnp.float32)           # f32 accumulation
    o_ref[...] = (acc + b_ref[...].astype(jnp.float32) + x).astype(o_ref.dtype)


def _fused_ln_mlp_residual_kernel(x_ref, w1_ref, b1_ref, w2_ref, b2_ref,
                                  lnw_ref, lnb_ref, o_ref,
                                  *, embed_dim, eps, approx):
    """out = x + fc2(GELU(fc1(LN(x)))). Fully fused: the hidden activation stays
    in VMEM, both weights (bf16) resident, residual in the fc2 epilogue."""
    x = x_ref[...].astype(jnp.float32)                         # (tm, D)
    mean = jnp.mean(x, axis=-1, keepdims=True)
    c = x - mean
    var = jnp.sum(c * c, axis=-1, keepdims=True) / (embed_dim - 1)
    inv = pl.reciprocal(jnp.sqrt(var) + eps, approx=approx)
    normed = (lnw_ref[...].astype(jnp.float32) * (c * inv)
              + lnb_ref[...].astype(jnp.float32))
    h = jnp.dot(normed.astype(jnp.bfloat16), w1_ref[...],
                preferred_element_type=jnp.float32)             # (tm, H)
    h = _gelu_tanh(h + b1_ref[...].astype(jnp.float32))
    acc = jnp.dot(h.astype(jnp.bfloat16), w2_ref[...],
                  preferred_element_type=jnp.float32)           # (tm, D)
    o_ref[...] = (acc + b2_ref[...].astype(jnp.float32) + x).astype(o_ref.dtype)


# ------------------------------- wrappers ----------------------------------- #

def layernorm_pallas(x2d, weight, bias, *, eps=1e-6, approx=True):
    """x2d: (M, D); weight/bias: (D,). Custom ViT LayerNorm (unbiased std)."""
    M, D = x2d.shape
    tm = _pick_row_tile(M, D)
    kernel = functools.partial(_layernorm_kernel, embed_dim=D, eps=eps, approx=approx)
    return pl.pallas_call(
        kernel,
        out_shape=jax.ShapeDtypeStruct((M, D), x2d.dtype),
        grid_spec=pltpu.PrefetchScalarGridSpec(
            num_scalar_prefetch=0,
            grid=(pl.cdiv(M, tm),),
            in_specs=[
                pl.BlockSpec((tm, D), lambda i: (i, 0)),
                pl.BlockSpec((1, D), lambda i: (0, 0)),
                pl.BlockSpec((1, D), lambda i: (0, 0)),
            ],
            out_specs=pl.BlockSpec((tm, D), lambda i: (i, 0)),
        ),
        compiler_params=pltpu.CompilerParams(
            dimension_semantics=("parallel",),
            vmem_limit_bytes=VMEM_LIMIT_BYTES),
    )(x2d, weight.reshape(1, D), bias.reshape(1, D))


def residual_add_pallas(x2d, y2d):
    M, D = x2d.shape
    tm = _pick_row_tile(M, D)
    return pl.pallas_call(
        _residual_add_kernel,
        out_shape=jax.ShapeDtypeStruct((M, D), x2d.dtype),
        grid_spec=pltpu.PrefetchScalarGridSpec(
            num_scalar_prefetch=0,
            grid=(pl.cdiv(M, tm),),
            in_specs=[
                pl.BlockSpec((tm, D), lambda i: (i, 0)),
                pl.BlockSpec((tm, D), lambda i: (i, 0)),
            ],
            out_specs=pl.BlockSpec((tm, D), lambda i: (i, 0)),
        ),
        compiler_params=pltpu.CompilerParams(
            dimension_semantics=("parallel",),
            vmem_limit_bytes=VMEM_LIMIT_BYTES),
    )(x2d, y2d)


def sublayer_connection_linear(x, lin_w, lin_b, norm_weight, norm_bias,
                               *, eps=1e-6, dropout=0.1, training=False,
                               approx=True):
    """Fully fused: out = x + drop_path(LN(x) @ lin_w + lin_b), one pallas_call.
    Requires a square D->D Linear sublayer. DropPath is identity in eval mode."""
    B, N, D = x.shape
    K, Dout = lin_w.shape
    assert K == D and Dout == D, "residual fusion requires a D->D Linear sublayer"
    del dropout, training  # DropPath / Dropout: identity in eval mode
    # TODO(synk): training-mode stochastic depth (per-sample mask via pltpu.prng_*).

    M = B * N
    x2d = x.reshape(M, D)
    w_bf16 = lin_w.astype(jnp.bfloat16)           # bf16 MXU operand (f32 accumulate)
    tm = _pick_fused_row_tile(M, D, Dout, resident_bytes=K * Dout * 2)

    kernel = functools.partial(_fused_ln_linear_residual_kernel,
                               embed_dim=D, eps=eps, approx=approx)
    out = pl.pallas_call(
        kernel,
        out_shape=jax.ShapeDtypeStruct((M, Dout), x.dtype),
        grid_spec=pltpu.PrefetchScalarGridSpec(
            num_scalar_prefetch=0,
            grid=(pl.cdiv(M, tm),),
            in_specs=[
                pl.BlockSpec((tm, K), lambda i: (i, 0)),     # x rows (LN input + residual)
                pl.BlockSpec((K, Dout), lambda i: (0, 0)),   # Linear weight, VMEM-resident
                pl.BlockSpec((1, Dout), lambda i: (0, 0)),   # Linear bias
                pl.BlockSpec((1, K), lambda i: (0, 0)),      # LN weight
                pl.BlockSpec((1, K), lambda i: (0, 0)),      # LN bias
            ],
            out_specs=pl.BlockSpec((tm, Dout), lambda i: (i, 0)),
        ),
        compiler_params=pltpu.CompilerParams(
            dimension_semantics=("parallel",),
            vmem_limit_bytes=VMEM_LIMIT_BYTES),
    )(x2d, w_bf16, lin_b.reshape(1, Dout), norm_weight.reshape(1, K),
      norm_bias.reshape(1, K))
    return out.reshape(B, N, Dout)


def sublayer_connection_mlp(x, fc1_w, fc1_b, fc2_w, fc2_b, norm_weight, norm_bias,
                            *, eps=1e-6, dropout=0.1, training=False, approx=True):
    """Fully fused MLP sublayer connection (EncoderLayer.sublayer[1]):
    out = x + fc2(GELU(fc1(LN(x)))). One pallas_call; hidden never hits HBM."""
    B, N, D = x.shape
    Din, H = fc1_w.shape
    H2, Dout = fc2_w.shape
    assert Din == D and H2 == H and Dout == D
    del dropout, training  # Dropout / DropPath: identity in eval mode

    M = B * N
    x2d = x.reshape(M, D)
    w1 = fc1_w.astype(jnp.bfloat16)
    w2 = fc2_w.astype(jnp.bfloat16)
    tm = _pick_fused_row_tile(M, D, Dout, hidden=H,
                              resident_bytes=(Din * H + H * Dout) * 2)

    kernel = functools.partial(_fused_ln_mlp_residual_kernel,
                               embed_dim=D, eps=eps, approx=approx)
    out = pl.pallas_call(
        kernel,
        out_shape=jax.ShapeDtypeStruct((M, Dout), x.dtype),
        grid_spec=pltpu.PrefetchScalarGridSpec(
            num_scalar_prefetch=0,
            grid=(pl.cdiv(M, tm),),
            in_specs=[
                pl.BlockSpec((tm, D), lambda i: (i, 0)),     # x rows (LN input + residual)
                pl.BlockSpec((D, H), lambda i: (0, 0)),      # fc1 weight, resident bf16
                pl.BlockSpec((1, H), lambda i: (0, 0)),      # fc1 bias
                pl.BlockSpec((H, Dout), lambda i: (0, 0)),   # fc2 weight, resident bf16
                pl.BlockSpec((1, Dout), lambda i: (0, 0)),   # fc2 bias
                pl.BlockSpec((1, D), lambda i: (0, 0)),      # LN weight
                pl.BlockSpec((1, D), lambda i: (0, 0)),      # LN bias
            ],
            out_specs=pl.BlockSpec((tm, Dout), lambda i: (i, 0)),
        ),
        compiler_params=pltpu.CompilerParams(
            dimension_semantics=("parallel",),
            vmem_limit_bytes=VMEM_LIMIT_BYTES),
    )(x2d, w1, fc1_b.reshape(1, H), w2, fc2_b.reshape(1, Dout),
      norm_weight.reshape(1, D), norm_bias.reshape(1, D))
    return out.reshape(B, N, Dout)


def sublayer_connection(x, sublayer, norm_weight, norm_bias,
                        *, eps=1e-6, dropout=0.1, training=False, approx=True):
    """Generic path for arbitrary `sublayer` callables (e.g. multi-head attention):
    LN kernel (large row tiles) -> sublayer in plain JAX -> residual-add kernel."""
    B, N, D = x.shape
    x2d = x.reshape(B * N, D)
    normed = layernorm_pallas(x2d, norm_weight, norm_bias, eps=eps, approx=approx)
    sub_out = sublayer(normed.reshape(B, N, D)).reshape(B * N, D)
    del dropout, training  # DropPath / Dropout: identity in eval mode
    # TODO(synk): when the sublayer's final op is a known Linear, fold the residual
    # into that matmul's epilogue (as sublayer_connection_mlp does) instead of this
    # standalone residual-add pass.
    out = residual_add_pallas(x2d, sub_out)
    return out.reshape(B, N, D)


# ------------------------------ demo / check -------------------------------- #

if __name__ == "__main__":
    B, N, D, H = 2, 8, 128, 256              # lane-dense dims (multiples of 128)
    num_heads, head_dim = 4, D // 4
    key = jax.random.PRNGKey(0)
    keys = jax.random.split(key, 12)

    x = jax.random.normal(keys[0], (B, N, D), dtype=jnp.float32)

    # LayerNorm params for the two sublayer connections.
    ln0_w = 1.0 + 0.1 * jax.random.normal(keys[1], (D,), dtype=jnp.float32)
    ln0_b = 0.1 * jax.random.normal(keys[2], (D,), dtype=jnp.float32)
    ln1_w = 1.0 + 0.1 * jax.random.normal(keys[3], (D,), dtype=jnp.float32)
    ln1_b = 0.1 * jax.random.normal(keys[4], (D,), dtype=jnp.float32)

    # Attention (sublayer[0]) params — used as the generic plain-JAX sublayer.
    Wqkv = 0.02 * jax.random.normal(keys[5], (D, 3 * D), dtype=jnp.float32)
    Wo = 0.02 * jax.random.normal(keys[6], (D, D), dtype=jnp.float32)
    bo = 0.02 * jax.random.normal(keys[7], (D,), dtype=jnp.float32)

    # MLP (sublayer[1]) params.
    W1 = 0.02 * jax.random.normal(keys[8], (D, H), dtype=jnp.float32)
    b1 = 0.02 * jax.random.normal(keys[9], (H,), dtype=jnp.float32)
    W2 = 0.02 * jax.random.normal(keys[10], (H, D), dtype=jnp.float32)
    b2 = 0.02 * jax.random.normal(keys[11], (D,), dtype=jnp.float32)

    def mha(h):   # plain-JAX multi-head attention (qkv_bias=False), eval mode
        qkv = jnp.einsum("bnd,de->bne", h, Wqkv)
        qkv = qkv.reshape(B, N, 3, num_heads, head_dim).transpose(2, 0, 3, 1, 4)
        q, k, v = qkv[0], qkv[1], qkv[2]
        scores = jnp.einsum("bhqd,bhkd->bhqk", q, k) / (head_dim ** 0.5)
        attn = jax.nn.softmax(scores, axis=-1)
        o = jnp.einsum("bhqk,bhkd->bhqd", attn, v)
        o = o.transpose(0, 2, 1, 3).reshape(B, N, D)
        return jnp.einsum("bnd,de->bne", o, Wo) + bo

    def ln_ref(h, w, b, eps=1e-6):           # exact-divide reference LayerNorm
        mean = jnp.mean(h, axis=-1, keepdims=True)
        c = h - mean
        std = jnp.sqrt(jnp.sum(c * c, axis=-1, keepdims=True) / (D - 1))
        return w * c / (std + eps) + b

    def mlp_ref(h):
        hh = _gelu_tanh(jnp.einsum("bnd,dh->bnh", h, W1) + b1)
        return jnp.einsum("bnh,hd->bnd", hh, W2) + b2

    # --- EncoderLayer forward (eval): x = x + attn(LN0(x)); x = x + MLP(LN1(x)) ---
    out_attn = sublayer_connection(x, mha, ln0_w, ln0_b)               # generic path
    out_enc = sublayer_connection_mlp(out_attn, W1, b1, W2, b2, ln1_w, ln1_b)
    out_enc = jax.block_until_ready(out_enc)

    # --- Fully fused D->D Linear sublayer connection (single pallas_call) ---
    out_lin = sublayer_connection_linear(x, Wo, bo, ln0_w, ln0_b)
    out_lin = jax.block_until_ready(out_lin)

    # --- Pure-JAX references matching the PyTorch semantics ---
    ref_attn = x + mha(ln_ref(x, ln0_w, ln0_b))
    ref_enc = ref_attn + mlp_ref(ln_ref(ref_attn, ln1_w, ln1_b))
    ref_lin = x + (jnp.einsum("bnd,de->bne", ln_ref(x, ln0_w, ln0_b), Wo) + bo)

    assert out_attn.shape == x.shape and out_attn.dtype == x.dtype
    assert out_enc.shape == x.shape and out_enc.dtype == x.dtype
    assert out_lin.shape == x.shape and out_lin.dtype == x.dtype
    # bf16 MXU operands + approx reciprocal => ~1e-3..1e-2 absolute error here.
    assert jnp.allclose(out_attn, ref_attn, atol=2e-2, rtol=2e-2)
    assert jnp.allclose(out_enc, ref_enc, atol=2e-2, rtol=2e-2)
    assert jnp.allclose(out_lin, ref_lin, atol=2e-2, rtol=2e-2)
    print("KERNEL_OK")
</pallas_src>

<mosaic_0001>
module attributes {stable_mosaic.version = 11 : i64} {
  func.func @_layernorm_kernel(%arg0: i32, %arg1: memref<16x128xf32, #tpu.memory_space<vmem>>, %arg2: memref<1x128xf32, #tpu.memory_space<vmem>>, %arg3: memref<1x128xf32, #tpu.memory_space<vmem>>, %arg4: memref<16x128xf32, #tpu.memory_space<vmem>>) attributes {dimension_semantics = [#tpu.dimension_semantics<parallel>], iteration_bounds = array<i64: 1>, scalar_prefetch = 0 : i64, scratch_operands = 0 : i64, tpu.core_type = #tpu.core_type<tc>, window_params = [{transform_indices = @transform_0, window_bounds = array<i64: 16, 128>}, {pipeline_mode = #tpu.pipeline_mode<synchronous>, transform_indices = @transform_1, window_bounds = array<i64: 1, 128>}, {pipeline_mode = #tpu.pipeline_mode<synchronous>, transform_indices = @transform_2, window_bounds = array<i64: 1, 128>}, {transform_indices = @transform_3, window_bounds = array<i64: 16, 128>}]} {
    %c0 = arith.constant 0 : index
    %c0_0 = arith.constant 0 : index
    %0 = vector.load %arg1[%c0, %c0_0] : memref<16x128xf32, #tpu.memory_space<vmem>>, vector<16x128xf32>
    %cst = arith.constant dense<0.000000e+00> : vector<16xf32>
    %1 = vector.multi_reduction <add>, %0, %cst [1] : vector<16x128xf32> to vector<16xf32>
    %2 = vector.shape_cast %1 : vector<16xf32> to vector<16x1xf32>
    %cst_1 = arith.constant 1.280000e+02 : f32
    %3 = vector.broadcast %cst_1 : f32 to vector<16x1xf32>
    %4 = arith.divf %2, %3 : vector<16x1xf32>
    %5 = vector.broadcast %4 : vector<16x1xf32> to vector<16x128xf32>
    %6 = arith.subf %0, %5 : vector<16x128xf32>
    %7 = arith.mulf %6, %6 : vector<16x128xf32>
    %cst_2 = arith.constant dense<0.000000e+00> : vector<16xf32>
    %8 = vector.multi_reduction <add>, %7, %cst_2 [1] : vector<16x128xf32> to vector<16xf32>
    %9 = vector.shape_cast %8 : vector<16xf32> to vector<16x1xf32>
    %cst_3 = arith.constant 1.270000e+02 : f32
    %10 = vector.broadcast %cst_3 : f32 to vector<16x1xf32>
    %11 = arith.divf %9, %10 : vector<16x1xf32>
    %12 = math.sqrt %11 : vector<16x1xf32>
    %cst_4 = arith.constant 9.99999997E-7 : f32
    %13 = vector.broadcast %cst_4 : f32 to vector<16x1xf32>
    %14 = arith.addf %12, %13 : vector<16x1xf32>
    %15 = tpu.reciprocal %14 {approx = true} : vector<16x1xf32> -> vector<16x1xf32>
    %c0_5 = arith.constant 0 : index
    %c0_6 = arith.constant 0 : index
    %16 = vector.load %arg2[%c0_5, %c0_6] : memref<1x128xf32, #tpu.memory_space<vmem>>, vector<1x128xf32>
    %17 = vector.broadcast %15 : vector<16x1xf32> to vector<16x128xf32>
    %18 = arith.mulf %6, %17 : vector<16x128xf32>
    %19 = vector.broadcast %16 : vector<1x128xf32> to vector<16x128xf32>
    %20 = arith.mulf %19, %18 : vector<16x128xf32>
    %c0_7 = arith.constant 0 : index
    %c0_8 = arith.constant 0 : index
    %21 = vector.load %arg3[%c0_7, %c0_8] : memref<1x128xf32, #tpu.memory_space<vmem>>, vector<1x128xf32>
    %22 = vector.broadcast %21 : vector<1x128xf32> to vector<16x128xf32>
    %23 = arith.addf %20, %22 : vector<16x128xf32>
    %c0_9 = arith.constant 0 : index
    %c0_10 = arith.constant 0 : index
    %24 = vector.load %arg4[%c0_9, %c0_10] : memref<16x128xf32, #tpu.memory_space<vmem>>, vector<16x128xf32>
    tpu.vector_store %arg4[%c0_9, %c0_10], %23 {strides = array<i32>} : memref<16x128xf32, #tpu.memory_space<vmem>>, vector<16x128xf32>,
    return
  }
  func.func @transform_0(%arg0: i32) -> (i32, i32) {
    %c0_i32 = arith.constant 0 : i32
    %c0_i32_0 = arith.constant 0 : i32
    return %arg0, %c0_i32 : i32, i32
  }
  func.func @transform_1(%arg0: i32) -> (i32, i32) {
    %c0_i32 = arith.constant 0 : i32
    %c0_i32_0 = arith.constant 0 : i32
    %c0_i32_1 = arith.constant 0 : i32
    return %c0_i32, %c0_i32_0 : i32, i32
  }
  func.func @transform_2(%arg0: i32) -> (i32, i32) {
    %c0_i32 = arith.constant 0 : i32
    %c0_i32_0 = arith.constant 0 : i32
    %c0_i32_1 = arith.constant 0 : i32
    return %c0_i32, %c0_i32_0 : i32, i32
  }
  func.func @transform_3(%arg0: i32) -> (i32, i32) {
    %c0_i32 = arith.constant 0 : i32
    %c0_i32_0 = arith.constant 0 : i32
    return %arg0, %c0_i32 : i32, i32
  }
}

</mosaic_0001>

<bundles_post_ra>
// kernel: tpu_custom_call.1
= control target key start
LH: loop header
LB: loop body
LE: loop exit
PB: predicated region body
PF: predicated region fallthrough
CT: control target
= control target key end

     0   :  { %8 = vsyncpa [#allocation3], 0  ;;  %s228_s0 = inlined_call_operand.hbm [shape: f32[16,128], index: 0, kind: input, shape index: {}]   ;;  %s229_s1 = inlined_call_operand.vmem [shape: f32[1,128], index: 1, kind: input, shape index: {}]   ;;  %s230_s2 = inlined_call_operand.vmem [shape: f32[1,128], index: 2, kind: input, shape index: {}]   ;;  %s231_s3 = inlined_call_operand.hbm [shape: f32[16,128], index: 3, kind: output, shape index: {}]  }
   0x1   :  { %9 = vsyncpa [#allocation4], 0  ;;  %s168_s12 = smov [#allocation2]   ;;  %s120_s16 = scalar_lea.hbm %s228_s0, 256 }
   0x2   :  { %s15_s13 = sshll.u32 %s168_s12, 4  ;;  %p121_p0 = scmp.ne.s32.totalorder %s228_s0, %s120_s16  ;;  %s16_s13 = int_to_ptr.vmem [resolvable:$true] %s15_s13 }
   0x3   :  { %p124_p1 = scmp.lt.u32.totalorder %s120_s16, %s228_s0 }
   0x5   :  { %p126_p2 = pnand %p124_p1, %p121_p0 }
   0x7   :  { %129 = shalt.err (!%p126_p2)
}
   0x8   :  { %s130_s21 = scalar_lea.vmem %s16_s13, 256  ;;  %p135_p4 = scmp.lt.s32.totalorder %s16_s13, %s16_s13 }
   0x9   :  { %p131_p3 = scmp.ne.s32.totalorder %s16_s13, %s130_s21  ;;  %p136_p5 = scmp.lt.s32.totalorder %s130_s21, %s130_s21 }
   0xb   :  { %p137_p6 = por %p136_p5, %p135_p4 }
   0xd   :  { %p138_p7 = pnand %p137_p6, %p131_p3 }
   0xf   :  { %141 = shalt.err (!%p138_p7)
}
  0x10   :  { %s169_s22 = smov 128   ;;  %s170_s23 = smov 8  }
  0x11   :  { %21 = dma.hbm_to_vmem [thread:$0]  %s228_s0, 256, %s16_s13, [#allocation3], %s169_s22, %s169_s22, %s170_s23  }
  0x12   :  { %164 = dma.done.wait [#allocation3], 256  }
  0x13   :  { %165 = vsyncadd [#allocation3], 4294967040  ;;  %v29_v0 = vld [vmem:[#allocation2] sm:$0xff]  ;;  %v30_v1 = vld [vmem:[#allocation2 + $0x8] sm:$0xff]  ;;  %s171_s29 = smov [#allocation5]  }
  0x14   :  { %31 = vadd.xlane.f32.xlu0 %v29_v0  ;;  %v106_v27 = vld [vmem:[%s229_s1] ss:$0 sm:$0xff]  ;;  %s94_s30 = sshll.u32 %s171_s29, 4  ;;  %s95_s30 = int_to_ptr.vmem [resolvable:$true] %s94_s30 }
  0x15   :  { %v107_v29 = vld [vmem:[%s230_s2] ss:$0 sm:$0xff]  ;;  %s142_s4 = scalar_lea.vmem %s95_s30, 256  ;;  %p147_p9 = scmp.lt.s32.totalorder %s95_s30, %s95_s30 }
  0x16   :  { %p143_p8 = scmp.ne.s32.totalorder %s95_s30, %s142_s4  ;;  %p148_p10 = scmp.lt.s32.totalorder %s142_s4, %s142_s4 }
  0x18   :  { %33 = vadd.xlane.f32.xlu0 %v30_v1  ;;  %p149_p11 = por %p148_p10, %p147_p9 }
  0x1a   :  { %p150_p12 = pnand %p149_p11, %p143_p8 }
  0xa1   :  { %v32_v2 = vpop.xlane.xlu0 %31 }
  0xa2   :  { %v36_v3 = vmul.f32 0.0078125, %v32_v2 }
  0xa4   :  { %v38_v4 = vsub.f32 %v29_v0, %v36_v3 }
  0xa5   :  { %v34_v5 = vpop.xlane.xlu0 %33 }
  0xa6   :  { %v37_v6 = vmul.f32 0.0078125, %v34_v5  ;;  %v40_v7 = vmul.f32 %v38_v4, %v38_v4 }
  0xa8   :  { %v39_v8 = vsub.f32 %v30_v1, %v37_v6  ;;  %42 = vadd.xlane.f32.xlu1 %v40_v7 }
  0xaa   :  { %v41_v9 = vmul.f32 %v39_v8, %v39_v8 }
  0xac   :  { %44 = vadd.xlane.f32.xlu1 %v41_v9 }
 0x135   :  { %v43_v10 = vpop.xlane.xlu1 %42 }
 0x136   :  { %v47_v11 = vmul.f32 0.007874016, %v43_v10 }
 0x138   :  { %112 = vrsqrt.f32 %v47_v11  ;;  %vm51_vm0 = vcmp.eq.f32.partialorder %v47_v11, inf  ;;  %v54_v16 = vand.u32 2147483648, %v47_v11  ;;  %vm53_vm1 = vcmp.eq.f32.partialorder %v47_v11, 0.0 }
 0x139   :  { %v45_v12 = vpop.xlane.xlu1 %44 }
 0x13a   :  { %v48_v13 = vmul.f32 0.007874016, %v45_v12 }
 0x13c   :  { %114 = vrsqrt.f32 %v48_v13  ;;  %vm58_vm2 = vcmp.eq.f32.partialorder %v48_v13, inf  ;;  %v61_v22 = vand.u32 2147483648, %v48_v13  ;;  %vm60_vm3 = vcmp.eq.f32.partialorder %v48_v13, 0.0 }
 0x142   :  { %v113_v14 = vpop.eup %112 }
 0x143   :  { %v50_v15 = vmul.f32 %v113_v14, %v47_v11 }
 0x145   :  { %v52_v17 = vsel %vm51_vm0, %v47_v11, %v50_v15 }
 0x146   :  { %v115_v18 = vpop.eup %114  ;;  %v55_v19 = vsel %vm53_vm1, %v54_v16, %v52_v17 }
 0x147   :  { %v57_v20 = vmul.f32 %v115_v18, %v48_v13  ;;  %v63_v21 = vadd.f32 1e-06, %v55_v19 }
 0x149   :  { %v59_v23 = vsel %vm58_vm2, %v48_v13, %v57_v20  ;;  %116 = vrcp.f32 %v63_v21 }
 0x14a   :  { %v62_v24 = vsel %vm60_vm3, %v61_v22, %v59_v23 }
 0x14b   :  { %v64_v25 = vadd.f32 1e-06, %v62_v24 }
 0x14d   :  { %118 = vrcp.f32 %v64_v25 }
 0x153   :  { %v117_v26 = vpop.eup %116 }
 0x154   :  { %v68_v28 = vmul.f32 %v117_v26, %v38_v4 }
 0x156   :  { %v76_v30 = vmul.f32 %v106_v27, %v68_v28 }
 0x157   :  { %v119_v31 = vpop.eup %118 }
 0x158   :  { %v69_v32 = vmul.f32 %v119_v31, %v39_v8  ;;  %v85_v33 = vadd.f32 %v107_v29, %v76_v30 }
 0x15a   :  { %v77_v34 = vmul.f32 %v106_v27, %v69_v32  ;;  %87 = vst [vmem:[#allocation5] sm:$0xff] %v85_v33 }
 0x15c   :  { %v86_v35 = vadd.f32 %v107_v29, %v77_v34 }
 0x15e   :  { %88 = vst [vmem:[#allocation5 + $0x8] sm:$0xff] %v86_v35 }
 0x15f   :  { %153 = shalt.err (!%p150_p12)
}
 0x160   :  { %s154_s5 = scalar_lea.hbm %s231_s3, 256 }
 0x161   :  { %p155_p13 = scmp.ne.s32.totalorder %s231_s3, %s154_s5  ;;  %p158_p0 = scmp.lt.u32.totalorder %s154_s5, %s231_s3 }
 0x163   :  { %p160_p1 = pnand %p158_p0, %p155_p13 }
 0x165   :  { %163 = shalt.err (!%p160_p1)
}
 0x166   :  { %100 = dma.vmem_to_hbm [thread:$0]  %s95_s30, 256, %s231_s3, [#allocation4], %s169_s22, %s169_s22, %s170_s23  }
 0x167   :  { %166 = dma.done.wait [#allocation4], 256  }
 0x168   :  { %167 = vsyncadd [#allocation4], 4294967040 }
 0x169   :  { %104 = vsyncpa [#allocation3], 1 }
 0x16a   :  { %105 = vsyncpa [#allocation4], 1 }

</bundles_post_ra>
